<compile_context>
chip_gen: v6e
topology: v6e:2x2x1
jax: 0.10.0
libtpu: 0.0.40
codegen_flags: <defaults>
</compile_context>

<pallas_src>
import functools
import re

import jax
import jax.numpy as jnp
import numpy as np
from jax.experimental import pallas as pl
from jax.experimental.pallas import tpu as pltpu


def _round_up(v, m):
    return ((v + m - 1) // m) * m


def _pick_row_tile(n_pad, target):
    """Largest multiple of 128 that divides n_pad and is <= target (n_pad % 128 == 0)."""
    best = 128
    t = 128
    while t <= min(target, n_pad):
        if n_pad % t == 0:
            best = t
        t += 128
    return best


def _tpu_hardware():
    """Returns (physical VMEM bytes per core, is_v7_or_later) with safe fallbacks."""
    kind = ""
    try:
        kind = jax.devices()[0].device_kind.lower()
    except Exception:
        pass
    m = re.search(r"v(\d+)", kind)
    gen = int(m.group(1)) if m else 0
    is_v7 = gen >= 7
    vmem = None
    try:
        vmem = int(pltpu.get_tpu_info().vmem_capacity_bytes)
    except Exception:
        vmem = None
    if not vmem:
        vmem = (64 << 20) if is_v7 else (128 << 20)
    # clamp against the per-TensorCore physical size for the detected generation
    vmem = min(vmem, (64 << 20) if is_v7 else (128 << 20))
    return vmem, is_v7


def gcn_stack_kernel(a_ref, x_ref, w_ref, b_ref, p_ref, inv_ref, o_ref,
                     h_ref, hw_ref, *, pool_function, row_tile):
    layer = pl.program_id(0)
    row = pl.program_id(1)
    last_layer = pl.num_programs(0) - 1
    last_row = pl.num_programs(1) - 1

    # Once per layer (row tile 0): HW = H @ W_l  (bf16 operands, f32 accumulation), cached in
    # bf16 VMEM for every row tile of this layer. Layer 0 consumes the bf16 input features
    # directly -- no f32 x->h_ref staging copy.
    @pl.when(jnp.logical_and(row == 0, layer == 0))
    def _():
        hw = jnp.dot(x_ref[...], w_ref[...], preferred_element_type=jnp.float32)
        hw_ref[...] = hw.astype(jnp.bfloat16)

    @pl.when(jnp.logical_and(row == 0, layer != 0))
    def _():
        hw = jnp.dot(h_ref[...], w_ref[...], preferred_element_type=jnp.float32)
        hw_ref[...] = hw.astype(jnp.bfloat16)

    # Per row tile:  rows <- relu( A_tile @ HW + b_l ).
    # NOTE: padded node rows become relu(b_l) != 0 here, but A's padded columns are zero (they
    # never feed real rows) and pooling masks them out below.
    agg = jnp.dot(a_ref[...], hw_ref[...], preferred_element_type=jnp.float32)
    h_rows = jnp.maximum(agg + b_ref[...], 0.0)
    start = pl.multiple_of(row * row_tile, row_tile)
    h_ref[pl.ds(start, row_tile), :] = h_rows.astype(jnp.bfloat16)

    # After the last row tile of the last layer: global pooling over nodes of each graph.
    @pl.when(jnp.logical_and(layer == last_layer, row == last_row))
    def _():
        hb = h_ref[...]                                   # (N_pad, H_pad) bf16
        if pool_function == "sum":
            o_ref[...] = jnp.dot(p_ref[...], hb, preferred_element_type=jnp.float32)
        elif pool_function == "mean":
            s = jnp.dot(p_ref[...], hb, preferred_element_type=jnp.float32)
            o_ref[...] = s * inv_ref[...]
        elif pool_function == "max":
            # ReLU guarantees h >= 0, so masked multiply is an exact max-pool and avoids the
            # (G, N_pad, H_pad) f32 where/-inf temporary. (A graph with zero valid nodes would
            # yield 0 rather than -inf.)
            masked = hb[None, :, :] * p_ref[...][:, :, None]
            o_ref[...] = jnp.max(masked, axis=1).astype(jnp.float32)
        else:
            raise ValueError(f"unknown pool_function: {pool_function}")


@functools.partial(jax.jit, static_argnames="pool_function")
def gcn_stack_forward(x, a_norm, weights, biases, pool_onehot, inv_counts,
                      pool_function):
    n_layer, hidden, _ = weights.shape
    num_nodes = x.shape[0]
    num_graphs = pool_onehot.shape[0]

    # --- generation-aware VMEM policy ----------------------------------------------------
    vmem_phys, is_v7 = _tpu_hardware()
    vmem_limit = (vmem_phys * 7) // 8          # headroom for compiler internal scratch
    a_budget = (vmem_phys * 3) // 8            # resident-A budget (~24 MiB v7x, ~48 MiB v5e/v6e)

    # --- layout padding: lane-dense hidden -----------------------------------------------
    h_pad = _round_up(hidden, 128)

    n_pad = _round_up(num_nodes, 16)
    if n_pad * n_pad * 2 <= a_budget:
        # A (bf16) stays resident in VMEM across all layers: single block, constant index.
        row_tile, n_row, a_buffers = n_pad, 1, 1
    else:
        # Stream A in row tiles (re-read once per layer) -- only for very large graphs.
        n_pad = _round_up(num_nodes, 128)      # 128 granularity keeps ghost-row waste low
        target = 256 if is_v7 else 512         # bigger tiles amortize per-step overhead
        row_tile = _pick_row_tile(n_pad, target)
        n_row = n_pad // row_tile
        a_buffers = min(3, n_row)              # deeper prefetch hides the per-layer H@W step
        resident = 6 * n_pad * h_pad + 4 * h_pad * h_pad * 2   # H+HW+x (bf16) + W dbl-buf
        while resident + a_buffers * row_tile * n_pad * 2 > vmem_limit and a_buffers > 2:
            a_buffers -= 1
        while resident + a_buffers * row_tile * n_pad * 2 > vmem_limit and row_tile > 128:
            row_tile = _pick_row_tile(n_pad, row_tile - 128)
            n_row = n_pad // row_tile

    # Zero padding: padded feature channels stay exactly 0; padded node rows become relu(b)
    # after each layer but are excluded from aggregation (zero A columns) and pooling (mask).
    a_bf = jnp.zeros((n_pad, n_pad), jnp.bfloat16).at[:num_nodes, :num_nodes].set(
        a_norm.astype(jnp.bfloat16))
    x_bf = jnp.zeros((n_pad, h_pad), jnp.bfloat16).at[:num_nodes, :hidden].set(
        x.astype(jnp.bfloat16))
    w_bf = jnp.zeros((n_layer, h_pad, h_pad), jnp.bfloat16).at[:, :hidden, :hidden].set(
        weights.astype(jnp.bfloat16))
    b_p = jnp.zeros((n_layer, 1, h_pad), jnp.float32).at[:, :, :hidden].set(biases)
    p_bf = jnp.zeros((num_graphs, n_pad), jnp.bfloat16).at[:, :num_nodes].set(
        pool_onehot.astype(jnp.bfloat16))
    inv_f = inv_counts.astype(jnp.float32)

    if n_row == 1:
        # Resident A: one constant-index block, single-buffered, DMA'd exactly once.
        a_spec = pl.BlockSpec((n_pad, n_pad), lambda l, r: (0, 0),
                              pipeline_mode=pl.Buffered(1))
    else:
        # Streamed A: row tiles with deeper buffering so DMA pipelines under the matmuls.
        a_spec = pl.BlockSpec((row_tile, n_pad), lambda l, r: (r, 0),
                              pipeline_mode=pl.Buffered(a_buffers))

    a_reads = n_layer if n_row > 1 else 1
    cost = pl.CostEstimate(
        flops=int(n_layer * (2 * n_pad * h_pad * h_pad + 2 * n_pad * n_pad * h_pad)
                  + 2 * num_graphs * n_pad * h_pad),
        transcendentals=0,
        bytes_accessed=int(a_bf.size * 2 * a_reads + x_bf.size * 2 + w_bf.size * 2
                           + b_p.size * 4 + p_bf.size * 2 + inv_f.size * 4
                           + num_graphs * h_pad * 4),
    )

    kernel = functools.partial(gcn_stack_kernel,
                               pool_function=pool_function,
                               row_tile=row_tile)

    out = pl.pallas_call(
        kernel,
        out_shape=jax.ShapeDtypeStruct((num_graphs, h_pad), jnp.float32),
        grid_spec=pltpu.PrefetchScalarGridSpec(
            num_scalar_prefetch=0,
            grid=(n_layer, n_row),
            in_specs=[
                a_spec,                                                     # A_norm
                pl.BlockSpec((n_pad, h_pad), lambda l, r: (0, 0),
                             pipeline_mode=pl.Buffered(1)),                 # x (constant)
                pl.BlockSpec((pl.Squeezed(), h_pad, h_pad),
                             lambda l, r: (l, 0, 0)),                       # W_l
                pl.BlockSpec((pl.Squeezed(), 1, h_pad),
                             lambda l, r: (l, 0, 0)),                       # b_l
                pl.BlockSpec((num_graphs, n_pad), lambda l, r: (0, 0),
                             pipeline_mode=pl.Buffered(1)),                 # pool one-hot (bf16)
                pl.BlockSpec((num_graphs, 1), lambda l, r: (0, 0),
                             pipeline_mode=pl.Buffered(1)),                 # 1/counts (f32)
            ],
            out_specs=pl.BlockSpec((num_graphs, h_pad), lambda l, r: (0, 0)),
            scratch_shapes=[
                pltpu.VMEM((n_pad, h_pad), jnp.bfloat16),   # resident node features H (bf16)
                pltpu.VMEM((n_pad, h_pad), jnp.bfloat16),   # HW cache for current layer (bf16)
            ],
        ),
        compiler_params=pltpu.CompilerParams(
            # Correctness requires strictly sequential grid execution (shared H/HW scratch,
            # layer dependence) -- never mark these axes "parallel".
            dimension_semantics=("arbitrary", "arbitrary"),
            vmem_limit_bytes=int(vmem_limit)),
        cost_estimate=cost,
    )(a_bf, x_bf, w_bf, b_p, p_bf, inv_f)

    return out[:, :hidden]


def build_normalized_adjacency(edge_index, num_nodes):
    """GCNConv's gcn_norm: add self-loops, A_norm[i,j] = d_i^-1/2 * Â[i,j] * d_j^-1/2,
    with Â[dst, src] = 1 and degree = row-sum of Â."""
    src = jnp.asarray(edge_index[0], jnp.int32)
    dst = jnp.asarray(edge_index[1], jnp.int32)
    loop = jnp.arange(num_nodes, dtype=jnp.int32)
    src = jnp.concatenate([src, loop])
    dst = jnp.concatenate([dst, loop])
    a = jnp.zeros((num_nodes, num_nodes), jnp.float32).at[dst, src].add(1.0)
    deg = a.sum(axis=1)
    dinv = jnp.where(deg > 0, 1.0 / jnp.sqrt(deg), 0.0)
    return dinv[:, None] * a * dinv[None, :]


if __name__ == "__main__":
    key = jax.random.PRNGKey(0)

    n_layer = 3
    hidden = 32
    num_graphs = 2
    nodes_per_graph = 8
    num_nodes = num_graphs * nodes_per_graph
    pool_function = "mean"   # one of 'max' | 'mean' | 'sum'

    # batch assignment: nodes 0..7 -> graph 0, nodes 8..15 -> graph 1
    batch = jnp.repeat(jnp.arange(num_graphs, dtype=jnp.int32), nodes_per_graph)

    # deterministic edge_index: bidirectional ring inside each graph
    src_list, dst_list = [], []
    for g in range(num_graphs):
        base = g * nodes_per_graph
        for i in range(nodes_per_graph):
            a_ = base + i
            b_ = base + (i + 1) % nodes_per_graph
            src_list += [a_, b_]
            dst_list += [b_, a_]
    edge_index = jnp.array([src_list, dst_list], dtype=jnp.int32)

    k1, k2, k3 = jax.random.split(key, 3)
    x = jax.random.normal(k1, (num_nodes, hidden), dtype=jnp.float32)
    scale = 1.0 / jnp.sqrt(hidden)
    weights = jax.random.normal(k2, (n_layer, hidden, hidden), jnp.float32) * scale
    biases = jax.random.normal(k3, (n_layer, 1, hidden), jnp.float32) * 0.1

    a_norm = build_normalized_adjacency(edge_index, num_nodes)
    pool_onehot = (batch[None, :] ==
                   jnp.arange(num_graphs)[:, None]).astype(jnp.float32)
    counts = pool_onehot.sum(axis=1, keepdims=True)
    inv_counts = 1.0 / counts

    out = gcn_stack_forward(x, a_norm, weights, biases, pool_onehot,
                            inv_counts, pool_function)
    out = jax.block_until_ready(out)

    # Plain-JAX reference of the same forward pass, mimicking the kernel's mixed precision
    # (bf16 matmul operands, f32 accumulation, bf16-resident hidden state, f32 pooling).
    hi = jax.lax.Precision.HIGHEST
    def qf(v):
        return v.astype(jnp.bfloat16).astype(jnp.float32)

    h = qf(x)
    a_q = qf(a_norm)
    for l in range(n_layer):
        hw = qf(jnp.dot(h, qf(weights[l]), precision=hi))
        h = qf(jnp.maximum(jnp.dot(a_q, hw, precision=hi) + biases[l], 0.0))
    if pool_function == "sum":
        ref = jnp.dot(pool_onehot, h, precision=hi)
    elif pool_function == "mean":
        ref = jnp.dot(pool_onehot, h, precision=hi) * inv_counts
    else:  # max
        ref = jnp.where(pool_onehot[:, :, None] > 0.5, h[None], -jnp.inf).max(axis=1)

    np.testing.assert_allclose(np.asarray(out), np.asarray(ref),
                               rtol=1e-2, atol=1e-2)
    print("KERNEL_OK")
</pallas_src>

<mosaic_0001>
module attributes {stable_mosaic.version = 11 : i64} {
  func.func @gcn_stack_kernel(%arg0: i32, %arg1: i32, %arg2: memref<16x16xbf16, #tpu.memory_space<vmem>>, %arg3: memref<16x128xbf16, #tpu.memory_space<vmem>>, %arg4: memref<1x128x128xbf16, #tpu.memory_space<vmem>>, %arg5: memref<1x1x128xf32, #tpu.memory_space<vmem>>, %arg6: memref<2x16xbf16, #tpu.memory_space<vmem>>, %arg7: memref<2x1xf32, #tpu.memory_space<vmem>>, %arg8: memref<2x128xf32, #tpu.memory_space<vmem>>, %arg9: memref<16x128xbf16, #tpu.memory_space<vmem>>, %arg10: memref<16x128xbf16, #tpu.memory_space<vmem>>) attributes {dimension_semantics = [#tpu.dimension_semantics<arbitrary>, #tpu.dimension_semantics<arbitrary>], iteration_bounds = array<i64: 3, 1>, scalar_prefetch = 0 : i64, scratch_operands = 2 : i64, tpu.core_type = #tpu.core_type<tc>, window_params = [{pipeline_mode = #tpu.pipeline_mode<synchronous>, transform_indices = @transform_0, window_bounds = array<i64: 16, 16>}, {pipeline_mode = #tpu.pipeline_mode<synchronous>, transform_indices = @transform_1, window_bounds = array<i64: 16, 128>}, {transform_indices = @transform_2, window_bounds = array<i64: 1, 128, 128>}, {transform_indices = @transform_3, window_bounds = array<i64: 1, 1, 128>}, {pipeline_mode = #tpu.pipeline_mode<synchronous>, transform_indices = @transform_4, window_bounds = array<i64: 2, 16>}, {pipeline_mode = #tpu.pipeline_mode<synchronous>, transform_indices = @transform_5, window_bounds = array<i64: 2, 1>}, {pipeline_mode = #tpu.pipeline_mode<synchronous>, transform_indices = @transform_6, window_bounds = array<i64: 2, 128>}]} {
    %c0_i32 = arith.constant 0 : i32
    %0 = arith.cmpi eq, %arg1, %c0_i32 : i32
    %c0_i32_0 = arith.constant 0 : i32
    %1 = arith.cmpi eq, %arg0, %c0_i32_0 : i32
    %2 = arith.andi %0, %1 : i1
    %3 = arith.extui %2 : i1 to i32
    %c0_i32_1 = arith.constant 0 : i32
    %4 = arith.cmpi ne, %3, %c0_i32_1 : i32
    scf.if %4 {
      %c0_15 = arith.constant 0 : index
      %c0_16 = arith.constant 0 : index
      %29 = vector.load %arg3[%c0_15, %c0_16] : memref<16x128xbf16, #tpu.memory_space<vmem>>, vector<16x128xbf16>
      %c0_17 = arith.constant 0 : index
      %c0_18 = arith.constant 0 : index
      %c0_19 = arith.constant 0 : index
      %30 = vector.load %arg4[%c0_17, %c0_18, %c0_19] : memref<1x128x128xbf16, #tpu.memory_space<vmem>>, vector<1x128x128xbf16>
      %31 = vector.shape_cast %30 : vector<1x128x128xbf16> to vector<128x128xbf16>
      %cst_20 = arith.constant dense<0.000000e+00> : vector<16x128xf32>
      %32 = tpu.matmul %29, %31, %cst_20 {dimension_numbers = #tpu.dot_dimension_numbers<[1], [0], [0], [1], [0, 0, 1, 1], [], []>} : vector<16x128xbf16>, vector<128x128xbf16>, vector<16x128xf32> -> vector<16x128xf32>
      %33 = arith.truncf %32 : vector<16x128xf32> to vector<16x128xbf16>
      %c0_21 = arith.constant 0 : index
      %c0_22 = arith.constant 0 : index
      %34 = vector.load %arg10[%c0_21, %c0_22] : memref<16x128xbf16, #tpu.memory_space<vmem>>, vector<16x128xbf16>
      tpu.vector_store %arg10[%c0_21, %c0_22], %33 {strides = array<i32>} : memref<16x128xbf16, #tpu.memory_space<vmem>>, vector<16x128xbf16>,
    } else {
    }
    %c0_i32_2 = arith.constant 0 : i32
    %5 = arith.cmpi eq, %arg1, %c0_i32_2 : i32
    %c0_i32_3 = arith.constant 0 : i32
    %6 = arith.cmpi ne, %arg0, %c0_i32_3 : i32
    %7 = arith.andi %5, %6 : i1
    %8 = arith.extui %7 : i1 to i32
    %c0_i32_4 = arith.constant 0 : i32
    %9 = arith.cmpi ne, %8, %c0_i32_4 : i32
    scf.if %9 {
      %c0_15 = arith.constant 0 : index
      %c0_16 = arith.constant 0 : index
      %29 = vector.load %arg9[%c0_15, %c0_16] : memref<16x128xbf16, #tpu.memory_space<vmem>>, vector<16x128xbf16>
      %c0_17 = arith.constant 0 : index
      %c0_18 = arith.constant 0 : index
      %c0_19 = arith.constant 0 : index
      %30 = vector.load %arg4[%c0_17, %c0_18, %c0_19] : memref<1x128x128xbf16, #tpu.memory_space<vmem>>, vector<1x128x128xbf16>
      %31 = vector.shape_cast %30 : vector<1x128x128xbf16> to vector<128x128xbf16>
      %cst_20 = arith.constant dense<0.000000e+00> : vector<16x128xf32>
      %32 = tpu.matmul %29, %31, %cst_20 {dimension_numbers = #tpu.dot_dimension_numbers<[1], [0], [0], [1], [0, 0, 1, 1], [], []>} : vector<16x128xbf16>, vector<128x128xbf16>, vector<16x128xf32> -> vector<16x128xf32>
      %33 = arith.truncf %32 : vector<16x128xf32> to vector<16x128xbf16>
      %c0_21 = arith.constant 0 : index
      %c0_22 = arith.constant 0 : index
      %34 = vector.load %arg10[%c0_21, %c0_22] : memref<16x128xbf16, #tpu.memory_space<vmem>>, vector<16x128xbf16>
      tpu.vector_store %arg10[%c0_21, %c0_22], %33 {strides = array<i32>} : memref<16x128xbf16, #tpu.memory_space<vmem>>, vector<16x128xbf16>,
    } else {
    }
    %c0 = arith.constant 0 : index
    %c0_5 = arith.constant 0 : index
    %10 = vector.load %arg2[%c0, %c0_5] : memref<16x16xbf16, #tpu.memory_space<vmem>>, vector<16x16xbf16>
    %c0_6 = arith.constant 0 : index
    %c0_7 = arith.constant 0 : index
    %11 = vector.load %arg10[%c0_6, %c0_7] : memref<16x128xbf16, #tpu.memory_space<vmem>>, vector<16x128xbf16>
    %cst = arith.constant dense<0.000000e+00> : vector<16x128xf32>
    %12 = tpu.matmul %10, %11, %cst {dimension_numbers = #tpu.dot_dimension_numbers<[1], [0], [0], [1], [0, 0, 1, 1], [], []>} : vector<16x16xbf16>, vector<16x128xbf16>, vector<16x128xf32> -> vector<16x128xf32>
    %c0_8 = arith.constant 0 : index
    %c0_9 = arith.constant 0 : index
    %c0_10 = arith.constant 0 : index
    %13 = vector.load %arg5[%c0_8, %c0_9, %c0_10] : memref<1x1x128xf32, #tpu.memory_space<vmem>>, vector<1x1x128xf32>
    %14 = vector.shape_cast %13 : vector<1x1x128xf32> to vector<1x128xf32>
    %15 = vector.broadcast %14 : vector<1x128xf32> to vector<16x128xf32>
    %16 = arith.addf %12, %15 : vector<16x128xf32>
    %cst_11 = arith.constant 0.000000e+00 : f32
    %17 = vector.broadcast %cst_11 : f32 to vector<16x128xf32>
    %18 = arith.maximumf %16, %17 : vector<16x128xf32>
    %c16_i32 = arith.constant 16 : i32
    %19 = arith.muli %arg1, %c16_i32 : i32
    %20 = tpu.assume_multiple %19, 16 : i32
    %21 = arith.truncf %18 : vector<16x128xf32> to vector<16x128xbf16>
    %22 = arith.index_cast %20 : i32 to index
    %c0_12 = arith.constant 0 : index
    %23 = vector.load %arg9[%22, %c0_12] : memref<16x128xbf16, #tpu.memory_space<vmem>>, vector<16x128xbf16>
    tpu.vector_store %arg9[%22, %c0_12], %21 {strides = array<i32>} : memref<16x128xbf16, #tpu.memory_space<vmem>>, vector<16x128xbf16>,
    %c2_i32 = arith.constant 2 : i32
    %24 = arith.cmpi eq, %arg0, %c2_i32 : i32
    %c0_i32_13 = arith.constant 0 : i32
    %25 = arith.cmpi eq, %arg1, %c0_i32_13 : i32
    %26 = arith.andi %24, %25 : i1
    %27 = arith.extui %26 : i1 to i32
    %c0_i32_14 = arith.constant 0 : i32
    %28 = arith.cmpi ne, %27, %c0_i32_14 : i32
    scf.if %28 {
      %c0_15 = arith.constant 0 : index
      %c0_16 = arith.constant 0 : index
      %29 = vector.load %arg9[%c0_15, %c0_16] : memref<16x128xbf16, #tpu.memory_space<vmem>>, vector<16x128xbf16>
      %c0_17 = arith.constant 0 : index
      %c0_18 = arith.constant 0 : index
      %30 = vector.load %arg6[%c0_17, %c0_18] : memref<2x16xbf16, #tpu.memory_space<vmem>>, vector<2x16xbf16>
      %cst_19 = arith.constant dense<0.000000e+00> : vector<2x128xf32>
      %31 = tpu.matmul %30, %29, %cst_19 {dimension_numbers = #tpu.dot_dimension_numbers<[1], [0], [0], [1], [0, 0, 1, 1], [], []>} : vector<2x16xbf16>, vector<16x128xbf16>, vector<2x128xf32> -> vector<2x128xf32>
      %c0_20 = arith.constant 0 : index
      %c0_21 = arith.constant 0 : index
      %32 = vector.load %arg7[%c0_20, %c0_21] : memref<2x1xf32, #tpu.memory_space<vmem>>, vector<2x1xf32>
      %33 = vector.broadcast %32 : vector<2x1xf32> to vector<2x128xf32>
      %34 = arith.mulf %31, %33 : vector<2x128xf32>
      %c0_22 = arith.constant 0 : index
      %c0_23 = arith.constant 0 : index
      %35 = vector.load %arg8[%c0_22, %c0_23] : memref<2x128xf32, #tpu.memory_space<vmem>>, vector<2x128xf32>
      tpu.vector_store %arg8[%c0_22, %c0_23], %34 {strides = array<i32>} : memref<2x128xf32, #tpu.memory_space<vmem>>, vector<2x128xf32>,
    } else {
    }
    return
  }
  func.func @transform_0(%arg0: i32, %arg1: i32) -> (i32, i32) {
    %c0_i32 = arith.constant 0 : i32
    %c0_i32_0 = arith.constant 0 : i32
    %c0_i32_1 = arith.constant 0 : i32
    return %c0_i32, %c0_i32_0 : i32, i32
  }
  func.func @transform_1(%arg0: i32, %arg1: i32) -> (i32, i32) {
    %c0_i32 = arith.constant 0 : i32
    %c0_i32_0 = arith.constant 0 : i32
    %c0_i32_1 = arith.constant 0 : i32
    return %c0_i32, %c0_i32_0 : i32, i32
  }
  func.func @transform_2(%arg0: i32, %arg1: i32) -> (i32, i32, i32) {
    %c0_i32 = arith.constant 0 : i32
    %c0_i32_0 = arith.constant 0 : i32
    %c0_i32_1 = arith.constant 0 : i32
    return %arg0, %c0_i32, %c0_i32_0 : i32, i32, i32
  }
  func.func @transform_3(%arg0: i32, %arg1: i32) -> (i32, i32, i32) {
    %c0_i32 = arith.constant 0 : i32
    %c0_i32_0 = arith.constant 0 : i32
    %c0_i32_1 = arith.constant 0 : i32
    return %arg0, %c0_i32, %c0_i32_0 : i32, i32, i32
  }
  func.func @transform_4(%arg0: i32, %arg1: i32) -> (i32, i32) {
    %c0_i32 = arith.constant 0 : i32
    %c0_i32_0 = arith.constant 0 : i32
    %c0_i32_1 = arith.constant 0 : i32
    return %c0_i32, %c0_i32_0 : i32, i32
  }
  func.func @transform_5(%arg0: i32, %arg1: i32) -> (i32, i32) {
    %c0_i32 = arith.constant 0 : i32
    %c0_i32_0 = arith.constant 0 : i32
    %c0_i32_1 = arith.constant 0 : i32
    return %c0_i32, %c0_i32_0 : i32, i32
  }
  func.func @transform_6(%arg0: i32, %arg1: i32) -> (i32, i32) {
    %c0_i32 = arith.constant 0 : i32
    %c0_i32_0 = arith.constant 0 : i32
    %c0_i32_1 = arith.constant 0 : i32
    return %c0_i32, %c0_i32_0 : i32, i32
  }
}

</mosaic_0001>

<bundles_post_ra>
// kernel: gcn_stack_forward.1
= control target key start
LH: loop header
LB: loop body
LE: loop exit
PB: predicated region body
PF: predicated region fallthrough
CT: control target
= control target key end

     0   :  { %11 = vsyncpa [#allocation5], 0  ;;  %s1038_s21 = smov 0   ;;  %s1040_s22 = smov 0   ;;  %s1137_s0 = inlined_call_operand.vmem [shape: bf16[16,16], index: 0, kind: input, shape index: {}]   ;;  %s1138_s1 = inlined_call_operand.vmem [shape: bf16[16,128], index: 1, kind: input, shape index: {}]   ;;  %s1139_s2 = inlined_call_operand.vmem [shape: bf16[3,128,128], index: 2, kind: input, shape index: {}]   ;;  %s1140_s3 = inlined_call_operand.vmem [shape: f32[3,1,128], index: 3, kind: input, shape index: {}]   ;;  %s1141_s4 = inlined_call_operand.vmem [shape: bf16[2,16], index: 4, kind: input, shape index: {}]   ;;  %s1142_s5 = inlined_call_operand.vmem [shape: f32[2,1], index: 5, kind: input, shape index: {}]   ;;  %s1143_s6 = inlined_call_operand.hbm [shape: f32[2,128], index: 6, kind: output, shape index: {}]  }
   0x1   :  { %s1042_s23 = smov 0  }
   0x2 LB: > { %s737_s24 = sadd.s32 4294967295, %s991_s23   ;;  %s29_s25 = sadd.s32 1, %s987_s22  ;;  %s991_s23 = sphi %s1042_s23, %s17_s23   ;;  %s987_s22 = sphi %s1040_s22, %s1146_s22   ;;  %s983_s21 = sphi %s1038_s21, %s1145_s21  }
   0x3   : > { %p31_p0 = scmp.ge.s32.totalorder %s29_s25, 3  ;;  %p740_p1 = scmp.ge.s32.totalorder %s991_s23, 1 }
   0x4   : > { %p228_p2 = scmp.lt.s32.totalorder %s991_s23, 4 }
   0x5   : > { %s1148_s25 = smov (%p31_p0, %s29_s25), 0 }
   0x6   : > { %p229_p3 = pnand %p740_p1, %p228_p2 }
   0x7   : > { %p256_p4 = scmp.lt.s32.totalorder (!%p229_p3), %s983_s21, 2  ;;  %p266_p5 = scmp.eq.s32.totalorder (!%p229_p3), %s983_s21, 0 }
   0x8   : > { %232 = sbr.rel (%p229_p3) target bundleno = 921 (0x399), region = 44 }
   0xd   : > { %s1062_s26 = scalar_select %p256_p4, %s983_s21, 2  ;;  %v993_v1 = vmov (%p266_p5), 0.0   ;;  %vm994_vm0 = vmmov (%p266_p5), 0   ;;  %v927_v9 = vld [vmem:[%s1138_s1] sm:$0xff] (%p266_p5)  }
   0xe   : > { %270 = sbr.rel (!%p266_p5) target bundleno = 249 (0xf9), region = 48  ;;  %827 = vmatprep.subr.bf16.mxu0 (%p266_p5), %v993_v1  ;;  %843 = vmatprep.mubr.msk.bf16.mxu0 (%p266_p5), %vm994_vm0, %v993_v1 }
   0xf   : > { %s780_s27 = sshll.u32 %s1062_s26, 6  ;;  %s263_s30 = scalar_lea.vmem %s1140_s3, %s1062_s26 }
  0x10   : > { %s1072_s9 = scalar_lea.vmem %s1139_s2, %s780_s27 }
  0x11   : > { %v919_v0 = vld [vmem:[%s1072_s9 + $0x38] sm:$0xff] (%p266_p5)   ;;  %v920_v2 = vld [vmem:[%s1072_s9 + $0x30] sm:$0xff] (%p266_p5)   ;;  %v921_v3 = vld [vmem:[%s1072_s9 + $0x28] sm:$0xff] (%p266_p5)  }
  0x12   : > { %828 = vmatpush3.bf16.msra.mxu0 (%p266_p5), %v919_v0  ;;  %v922_v4 = vld [vmem:[%s1072_s9 + $0x20] sm:$0xff] (%p266_p5)   ;;  %v923_v5 = vld [vmem:[%s1072_s9 + $0x18] sm:$0xff] (%p266_p5)   ;;  %v924_v6 = vld [vmem:[%s1072_s9 + $0x10] sm:$0xff] (%p266_p5)  }
  0x13   : > { %829 = vmatprep.subr.bf16.mxu0 %v993_v1  ;;  %v925_v7 = vld [vmem:[%s1072_s9 + $0x8] sm:$0xff]   ;;  %v926_v8 = vld [vmem:[%s1072_s9] sm:$0xff]  }
  0x16   : > { %830 = vmatpush3.bf16.msra.mxu0 %v920_v2 }
  0x17   : > { %831 = vmatprep.subr.bf16.mxu0 %v993_v1 }
  0x1a   : > { %832 = vmatpush3.bf16.msra.mxu0 %v921_v3 }
  0x1b   : > { %833 = vmatprep.subr.bf16.mxu0 %v993_v1 }
  0x1e   : > { %834 = vmatpush3.bf16.msra.mxu0 %v922_v4 }
  0x1f   : > { %835 = vmatprep.subr.bf16.mxu0 %v993_v1 }
  0x22   : > { %836 = vmatpush3.bf16.msra.mxu0 %v923_v5 }
  0x23   : > { %837 = vmatprep.subr.bf16.mxu0 %v993_v1 }
  0x26   : > { %838 = vmatpush3.bf16.msra.mxu0 %v924_v6 }
  0x27   : > { %839 = vmatprep.subr.bf16.mxu0 %v993_v1 }
  0x2a   : > { %840 = vmatpush3.bf16.msra.mxu0 %v925_v7 }
  0x2b   : > { %841 = vmatprep.subr.bf16.mxu0 %v993_v1 }
  0x2e   : > { %842 = vmatpush3.bf16.msra.mxu0 %v926_v8 }
  0x31   : > { %844 = vmatmul.mubr.bf16.vlgmr.msra.gmra.mxu0 %v927_v9 }
  0xf1   : > { %v377_v10 = vpop.f32.mrf.mxu0 }
  0xf3   : > { %v845_v11 = vpop.f32.mrf.mxu0 }
  0xf5   : > { %v380_v12 = vpop.f32.mrf.mxu0 }
  0xf6   : > { %v793_v13 = vpack.c.bf16 %v380_v12, %v377_v10 }
  0xf7   : > { %v846_v14 = vpop.f32.mrf.mxu0 }
  0xf8   : > { %794 = vst [vmem:[#allocation3] sm:$0xff] %v793_v13  }
  0xf9 PF: > { %p394_p6 = scmp.ne.s32.totalorder %s983_s21, 0 }
  0xfa   : > { %v928_v15 = vld [vmem:[%s1072_s9 + $0x38] sm:$0xff] (%p394_p6)   ;;  %v995_v16 = vmov (%p394_p6), 0.0   ;;  %v929_v17 = vld [vmem:[%s1072_s9 + $0x30] sm:$0xff] (%p394_p6)   ;;  %vm996_vm1 = vmmov (%p394_p6), 0   ;;  %v930_v18 = vld [vmem:[%s1072_s9 + $0x28] sm:$0xff] (%p394_p6)  }
  0xfb   : > { %398 = sbr.rel (!%p394_p6) target bundleno = 483 (0x1e3), region = 52  ;;  %847 = vmatprep.subr.bf16.mxu0 (%p394_p6), %v995_v16  ;;  %863 = vmatprep.mubr.msk.bf16.mxu0 (%p394_p6), %vm996_vm1, %v995_v16  ;;  %v931_v19 = vld [vmem:[%s1072_s9 + $0x20] sm:$0xff] (%p394_p6)   ;;  %v932_v20 = vld [vmem:[%s1072_s9 + $0x18] sm:$0xff] (%p394_p6)   ;;  %v933_v21 = vld [vmem:[%s1072_s9 + $0x10] sm:$0xff] (%p394_p6)  }
  0xfc   : > { %848 = vmatpush3.bf16.msra.mxu0 (%p394_p6), %v928_v15  ;;  %v934_v22 = vld [vmem:[%s1072_s9 + $0x8] sm:$0xff] (%p394_p6)   ;;  %v935_v23 = vld [vmem:[%s1072_s9] sm:$0xff] (%p394_p6)  }
  0xfd   : > { %849 = vmatprep.subr.bf16.mxu0 (%p394_p6), %v995_v16  ;;  %v936_v24 = vld [vmem:[#allocation2] sm:$0xff] (%p394_p6)  }
 0x100   : > { %850 = vmatpush3.bf16.msra.mxu0 %v929_v17 }
 0x101   : > { %851 = vmatprep.subr.bf16.mxu0 %v995_v16 }
 0x104   : > { %852 = vmatpush3.bf16.msra.mxu0 %v930_v18 }
 0x105   : > { %853 = vmatprep.subr.bf16.mxu0 %v995_v16 }
 0x108   : > { %854 = vmatpush3.bf16.msra.mxu0 %v931_v19 }
 0x109   : > { %855 = vmatprep.subr.bf16.mxu0 %v995_v16 }
 0x10c   : > { %856 = vmatpush3.bf16.msra.mxu0 %v932_v20 }
 0x10d   : > { %857 = vmatprep.subr.bf16.mxu0 %v995_v16 }
 0x110   : > { %858 = vmatpush3.bf16.msra.mxu0 %v933_v21 }
 0x111   : > { %859 = vmatprep.subr.bf16.mxu0 %v995_v16 }
 0x114   : > { %860 = vmatpush3.bf16.msra.mxu0 %v934_v22 }
 0x115   : > { %861 = vmatprep.subr.bf16.mxu0 %v995_v16 }
 0x118   : > { %862 = vmatpush3.bf16.msra.mxu0 %v935_v23 }
 0x11b   : > { %864 = vmatmul.mubr.bf16.vlgmr.msra.gmra.mxu0 %v936_v24 }
 0x1db   : > { %v505_v25 = vpop.f32.mrf.mxu0 }
 0x1dd   : > { %v865_v26 = vpop.f32.mrf.mxu0 }
 0x1df   : > { %v508_v27 = vpop.f32.mrf.mxu0 }
 0x1e0   : > { %v798_v28 = vpack.c.bf16 %v508_v27, %v505_v25 }
 0x1e1   : > { %v866_v29 = vpop.f32.mrf.mxu0 }
 0x1e2   : > { %799 = vst [vmem:[#allocation3] sm:$0xff] %v798_v28  }
 0x1e3 PF: > { %v997_v31 = vmov 0.0   ;;  %v938_v32 = vld [vmem:[%s1137_s0] sm:$0xff]   ;;  %vm998_vm2 = vmmov 0   ;;  %vm544_vm3 = vcmask 130048   ;;  %p606_p7 = scmp.eq.s32.totalorder %s983_s21, 2 }
 0x1e4   : > { %867 = vmatprep.subr.bf16.mxu0 %v997_v31  ;;  %869 = vmatprep.mubr.msk.bf16.mxu0 %vm998_vm2, %v997_v31  ;;  %v767_v33 = vld [vmem:[%s263_s30] ss:$0 sm:$0xff]  ;;  %v999_v44 = vmov (%p606_p7), 0.0   ;;  %vm1000_vm4 = vmmov (%p606_p7), 0   ;;  %v1001_v47 = vmov (%p606_p7), 0  }
 0x1e5   : > { %v663_v45 = vld [vmem:[%s1142_s5] sm:$0x3] (%p606_p7)  ;;  %939 = vset.pattern.permute.xlu0 (%p606_p7), %v1001_v47 }
 0x1e6   : > { %v613_v46 = vld [vmem:[%s1141_s4] sm:$0x1] (%p606_p7)  ;;  %666 = vperm.xlu0 (%p606_p7), %939, %v663_v45  }
 0x1e9   : > { %v937_v30 = vld [vmem:[#allocation3] sm:$0xff]  }
 0x1ea   : > { %868 = vmatpush3.bf16.msra.mxu0 %v937_v30 }
 0x1eb   : > { %873 = vmatprep.subr.bf16.mxu0 (%p606_p7), %v999_v44 }
 0x1ed   : > { %870 = vmatmul.mubr.msk.bf16.vlgmr.msra.gmra.mxu0 %vm544_vm3, %v938_v32 }
 0x1ee   : > { %875 = vmatprep.mubr.msk.bf16.mxu0 (%p606_p7), %vm1000_vm4, %v999_v44 }
 0x261   : > { %v667_v48 = vpop.permute.xlu0 (%p606_p7), %666 }
 0x2ad   : > { %v582_v34 = vpop.f32.mrf.mxu0 }
 0x2ae   : > { %v583_v36 = vadd.f32 %v767_v33, %v582_v34 }
 0x2af   : > { %v871_v35 = vpop.f32.mrf.mxu0 }
 0x2b0   : > { %v589_v40 = vmax.f32 %v583_v36, 0.0 }
 0x2b1   : > { %v585_v37 = vpop.f32.mrf.mxu0 }
 0x2b2   : > { %v586_v38 = vadd.f32 %v767_v33, %v585_v37 }
 0x2b3   : > { %v872_v39 = vpop.f32.mrf.mxu0 }
 0x2b4   : > { %v590_v41 = vmax.f32 %v586_v38, 0.0  ;;  %610 = sbr.rel (!%p606_p7) target bundleno = 906 (0x38a), region = 56 }
 0x2b6   : > { %v803_v42 = vpack.c.bf16 %v590_v41, %v589_v40 }
 0x2b8   : > { %804 = vst [vmem:[#allocation2] sm:$0xff] %v803_v42  }
 0x2bf   : > { %v940_v43 = vld [vmem:[#allocation2] sm:$0xff]  }
 0x2c0   : > { %874 = vmatpush3.bf16.msra.mxu0 %v940_v43 }
 0x2c3   : > { %876 = vmatmul.mubr.msk.bf16.vlgmr.msra.gmra.mxu0 %vm544_vm3, %v613_v46 }
 0x383   : > { %v657_v49 = vpop.f32.mrf.mxu0 }
 0x384   : > { %v669_v50 = vmul.f32 %v667_v48, %v657_v49 }
 0x385   : > { %v877_v51 = vpop.f32.mrf.mxu0 }
 0x386   : > { %670 = vst [vmem:[#allocation4] sm:$0x3] %v669_v50 }
 0x387   : > { %v660_v52 = vpop.f32.mrf.mxu0 }
 0x389   : > { %v878_v53 = vpop.f32.mrf.mxu0 }
 0x38a PF: > { %p1113_p8 = scmp.eq.s32.totalorder %s737_s24, 2  ;;  %s1002_s21 = smov [#allocation4]  }
 0x38b   : > { %s678_s26 = sshll.u32 %s1002_s21, 4  ;;  %s679_s26 = int_to_ptr.vmem [resolvable:$true] %s678_s26 }
 0x38c   : > { %s941_s27 = scalar_lea.vmem %s679_s26, 32  ;;  %p948_p12 = scmp.lt.s32.totalorder %s679_s26, %s679_s26 }
 0x38d   : > { %p942_p9 = scmp.ne.s32.totalorder %s679_s26, %s941_s27  ;;  %p949_p13 = scmp.lt.s32.totalorder %s941_s27, %s941_s27 }
 0x38f   : > { %p943_p10 = pnand %p942_p9, %p1113_p8  ;;  %p950_p0 = por %p949_p13, %p948_p12 }
 0x391   : > { %p944_p11 = pneg %p943_p10 }
 0x393   : > { %p951_p1 = pnand %p950_p0, %p944_p11 }
 0x395   : > { %954 = shalt.err (!%p951_p1)
}
 0x396   : > { %880 = dma.vmem_to_hbm [thread:$0]  (%p1113_p8), %s679_s26, 32, %s1143_s6, [#allocation5]  }
 0x397   : > { %978 = dma.done.wait (%p1113_p8), [#allocation5], 32  }
 0x398   : > { %980 = vsyncadd (%p1113_p8), [#allocation5], 4294967264 }
 0x399 PF: > { %s17_s23 = sadd.s32 1, %s991_s23   ;;  %s1145_s21 = smov %s987_s22 }
 0x39a   : > { %p14_p2 = scmp.ge.s32.totalorder %s17_s23, 5   ;;  %s1146_s22 = smov %s1148_s25 }
 0x39c   :  { %16 = sbr.rel (!%p14_p2) target bundleno = 2 (0x2), region = 87 }
 0x3a1   :  { %691 = vsyncpa [#allocation5], 1 }
 0x3a2   :  { %693 = vsyncpa [#allocation5 + $0x1], 1 }

</bundles_post_ra>
